<compile_context>
chip_gen: v7x
topology: tpu7x:2x2x1
jax: 0.10.0
libtpu: 0.0.40
codegen_flags: <defaults>
</compile_context>

<pallas_src>
import functools

import jax
import jax.numpy as jnp
from jax.experimental import pallas as pl
from jax.experimental.pallas import tpu as pltpu


def _round_up(x, m):
    return ((x + m - 1) // m) * m


def _choose_tm(batch, max_tm=512):
    """Batch tile: multiple of 8, divides round_up(batch, 8) (=> overshoot <= 7 rows),
    and >= 2 grid steps when the batch allows it (v7x megacore sharding)."""
    bp8 = _round_up(batch, 8)
    if bp8 <= 16:
        return bp8
    cap = min(max_tm, bp8 // 2)
    t = cap - (cap % 8)
    while bp8 % t != 0:
        t -= 8
    return t


def _mlp_kernel(n_layers, out_sizes, x_ref, *refs):
    """refs = (w_0, ..., w_{L-1}, bias_packed, out_ref).

    x_ref:  [tm, in_dim]                    f32
    w_i:    [in_i, out_i]                   f32 (last layer N padded to a multiple of 128)
    bias:   [n_layers, max_out]             f32 (row i holds bias of layer i, zero padded)
    out:    [tm, out_pad]                   f32 (lane-dense store)
    """
    out_ref = refs[-1]
    b_ref = refs[-2]
    w_refs = refs[:-2]

    h = x_ref[...]                                             # [tm, in_dim] f32
    for i in range(n_layers):
        w = w_refs[i][...]                                     # [in_i, out_i]
        b = b_ref[i:i + 1, :out_sizes[i]]                      # [1, out_i]
        h = jnp.dot(h, w, preferred_element_type=jnp.float32) + b
        if i < n_layers - 1:                                   # nn.ReLU() between hidden layers
            h = jnp.maximum(h, 0.0)
    # TODO(synk): for wide hidden layers (>= ~1.5k) stream weights as bf16 K/N tiles
    # (nested pltpu.emit_pipeline or a K grid axis + f32 VMEM accumulator) instead of the
    # fully VMEM-resident f32 weights used here; also watch tm*hidden vreg pressure.
    out_ref[...] = h.astype(out_ref.dtype)


def make_siamese_forward(weights, biases, *, max_tm=512):
    """Pad / pack parameters ONCE and return a jitted forward: x [B, in_dim] -> [B, out_dim].

    weights: list of [in_i, out_i] float32 (transposed vs. nn.Linear)
    biases:  list of [out_i] or [1, out_i] float32
    """
    n_layers = len(weights)
    dims = [weights[0].shape[0]] + [w.shape[1] for w in weights]
    in_dim, out_dim = dims[0], dims[-1]
    out_pad = _round_up(out_dim, 128)                          # lane-dense final store

    # --- one-time parameter preparation (hoisted out of the per-call path) ---------------
    w_list = [jnp.asarray(w, jnp.float32) for w in weights]
    # Zero-padding the last layer's output columns is mathematically inert (padded weight
    # columns and bias lanes are zero) and is sliced off after the kernel.
    w_list[-1] = (
        jnp.zeros((dims[-2], out_pad), jnp.float32).at[:, :out_dim].set(w_list[-1])
    )
    w_list = tuple(w_list)

    out_sizes = tuple(dims[1:-1] + [out_pad])                  # kernel-side width of layer i
    max_b = max(out_sizes)
    b_packed = jnp.zeros((n_layers, max_b), jnp.float32)
    for i, b in enumerate(biases):
        b_packed = b_packed.at[i, :dims[i + 1]].set(jnp.asarray(b, jnp.float32).reshape(-1))

    kernel = functools.partial(_mlp_kernel, n_layers, out_sizes)

    def _forward(x):
        B = x.shape[0]
        tm = _choose_tm(B, max_tm)
        B_p = _round_up(B, tm)                                 # overshoot <= 7 rows by design
        x_p = x if B_p == B else jnp.zeros((B_p, in_dim), x.dtype).at[:B].set(x)

        in_specs = [pl.BlockSpec((tm, in_dim), lambda i: (i, 0))]
        for w in w_list:                                       # full-array (untiled) weights
            in_specs.append(pl.BlockSpec(w.shape, lambda i: (0, 0)))
        in_specs.append(pl.BlockSpec(b_packed.shape, lambda i: (0, 0)))
        out_spec = pl.BlockSpec((tm, out_pad), lambda i: (i, 0))

        # VMEM footprint (double-buffered blocks) + headroom; clamp below v7x's 64 MiB.
        est = 2 * tm * (in_dim + out_pad) * 4
        est += 2 * sum(int(w.shape[0]) * int(w.shape[1]) for w in w_list) * 4
        est += 2 * n_layers * max_b * 4
        est += 4 * tm * max(dims + [out_pad]) * 4              # activation temporaries
        vmem_limit = int(min(max(32 << 20, 2 * est), 56 << 20))
        # TODO(synk): when grid > 1 and weights are large, single-buffer the constant-index
        # weight blocks (pipeline_mode=pl.Buffered(1)) to halve resident-weight VMEM.

        out_p = pl.pallas_call(
            kernel,
            out_shape=jax.ShapeDtypeStruct((B_p, out_pad), jnp.float32),
            grid_spec=pltpu.PrefetchScalarGridSpec(
                num_scalar_prefetch=0,
                grid=(B_p // tm,),
                in_specs=in_specs,
                out_specs=out_spec,
            ),
            compiler_params=pltpu.CompilerParams(
                dimension_semantics=("parallel",),
                vmem_limit_bytes=vmem_limit,
            ),
        )(x_p, *w_list, b_packed)
        return out_p[:B, :out_dim]

    return jax.jit(_forward)


def init_params(layer_sizes, key):
    """Matches Siamese.__init__: xavier_normal_ weights (sampled directly in [in, out]
    layout, same distribution), zero biases."""
    weights, biases = [], []
    for idx in range(len(layer_sizes) - 1):
        fan_in, fan_out = layer_sizes[idx], layer_sizes[idx + 1]
        key, sub = jax.random.split(key)
        std = (2.0 / (fan_in + fan_out)) ** 0.5
        weights.append(std * jax.random.normal(sub, (fan_in, fan_out), dtype=jnp.float32))
        biases.append(jnp.zeros((fan_out,), dtype=jnp.float32))
    return weights, biases


def reference_forward(x, weights, biases):
    h = x
    for i, (w, b) in enumerate(zip(weights, biases)):
        h = h @ w + b.reshape(1, -1)
        if i < len(weights) - 1:
            h = jnp.maximum(h, 0.0)
    return h


if __name__ == "__main__":
    layer_sizes = [32, 64, 32, 16]        # Siamese(layer_sizes=[32, 64, 32, 16])
    batch = 16                            # per branch

    key = jax.random.PRNGKey(0)
    key, k1, k2 = jax.random.split(key, 3)
    x1 = jax.random.normal(k1, (batch, layer_sizes[0]), dtype=jnp.float32)
    x2 = jax.random.normal(k2, (batch, layer_sizes[0]), dtype=jnp.float32)

    weights, biases = init_params(layer_sizes, key)
    forward = make_siamese_forward(weights, biases)

    # Siamese: the two branches share the encoder, so run them as ONE stacked batch
    # (one kernel launch, one weight DMA) and split the result.
    stacked = jnp.concatenate([x1, x2], axis=0)               # [2B, in_dim]
    out = jax.block_until_ready(forward(stacked))
    out1, out2 = out[:batch], out[batch:]

    ref1 = reference_forward(x1, weights, biases)
    ref2 = reference_forward(x2, weights, biases)

    assert out1.shape == (batch, layer_sizes[-1])
    assert out2.shape == (batch, layer_sizes[-1])
    assert jnp.allclose(out1, ref1, atol=1e-4, rtol=1e-4), "branch-1 mismatch vs JAX reference"
    assert jnp.allclose(out2, ref2, atol=1e-4, rtol=1e-4), "branch-2 mismatch vs JAX reference"

    print("KERNEL_OK")
</pallas_src>

<mosaic_0001>
module attributes {stable_mosaic.version = 11 : i64} {
  func.func @_mlp_kernel(%arg0: i32, %arg1: memref<16x32xf32, #tpu.memory_space<vmem>>, %arg2: memref<32x64xf32, #tpu.memory_space<vmem>>, %arg3: memref<64x32xf32, #tpu.memory_space<vmem>>, %arg4: memref<32x128xf32, #tpu.memory_space<vmem>>, %arg5: memref<3x128xf32, #tpu.memory_space<vmem>>, %arg6: memref<16x128xf32, #tpu.memory_space<vmem>>) attributes {dimension_semantics = [#tpu.dimension_semantics<parallel>], iteration_bounds = array<i64: 2>, scalar_prefetch = 0 : i64, scratch_operands = 0 : i64, tpu.core_type = #tpu.core_type<tc>, window_params = [{transform_indices = @transform_0, window_bounds = array<i64: 16, 32>}, {pipeline_mode = #tpu.pipeline_mode<synchronous>, transform_indices = @transform_1, window_bounds = array<i64: 32, 64>}, {pipeline_mode = #tpu.pipeline_mode<synchronous>, transform_indices = @transform_2, window_bounds = array<i64: 64, 32>}, {pipeline_mode = #tpu.pipeline_mode<synchronous>, transform_indices = @transform_3, window_bounds = array<i64: 32, 128>}, {pipeline_mode = #tpu.pipeline_mode<synchronous>, transform_indices = @transform_4, window_bounds = array<i64: 3, 128>}, {transform_indices = @transform_5, window_bounds = array<i64: 16, 128>}]} {
    %c0 = arith.constant 0 : index
    %c0_0 = arith.constant 0 : index
    %0 = vector.load %arg1[%c0, %c0_0] : memref<16x32xf32, #tpu.memory_space<vmem>>, vector<16x32xf32>
    %c0_1 = arith.constant 0 : index
    %c0_2 = arith.constant 0 : index
    %1 = vector.load %arg2[%c0_1, %c0_2] : memref<32x64xf32, #tpu.memory_space<vmem>>, vector<32x64xf32>
    %c0_3 = arith.constant 0 : index
    %c0_4 = arith.constant 0 : index
    %2 = vector.load %arg5[%c0_3, %c0_4] : memref<3x128xf32, #tpu.memory_space<vmem>>, vector<1x64xf32>
    %cst = arith.constant dense<0.000000e+00> : vector<16x64xf32>
    %3 = tpu.matmul %0, %1, %cst {dimension_numbers = #tpu.dot_dimension_numbers<[1], [0], [0], [1], [0, 0, 1, 1], [], []>} : vector<16x32xf32>, vector<32x64xf32>, vector<16x64xf32> -> vector<16x64xf32>
    %4 = vector.broadcast %2 : vector<1x64xf32> to vector<16x64xf32>
    %5 = arith.addf %3, %4 : vector<16x64xf32>
    %cst_5 = arith.constant 0.000000e+00 : f32
    %6 = vector.broadcast %cst_5 : f32 to vector<16x64xf32>
    %7 = arith.maximumf %5, %6 : vector<16x64xf32>
    %c0_6 = arith.constant 0 : index
    %c0_7 = arith.constant 0 : index
    %8 = vector.load %arg3[%c0_6, %c0_7] : memref<64x32xf32, #tpu.memory_space<vmem>>, vector<64x32xf32>
    %c1 = arith.constant 1 : index
    %c0_8 = arith.constant 0 : index
    %9 = vector.load %arg5[%c1, %c0_8] : memref<3x128xf32, #tpu.memory_space<vmem>>, vector<1x32xf32>
    %cst_9 = arith.constant dense<0.000000e+00> : vector<16x32xf32>
    %10 = tpu.matmul %7, %8, %cst_9 {dimension_numbers = #tpu.dot_dimension_numbers<[1], [0], [0], [1], [0, 0, 1, 1], [], []>} : vector<16x64xf32>, vector<64x32xf32>, vector<16x32xf32> -> vector<16x32xf32>
    %11 = vector.broadcast %9 : vector<1x32xf32> to vector<16x32xf32>
    %12 = arith.addf %10, %11 : vector<16x32xf32>
    %cst_10 = arith.constant 0.000000e+00 : f32
    %13 = vector.broadcast %cst_10 : f32 to vector<16x32xf32>
    %14 = arith.maximumf %12, %13 : vector<16x32xf32>
    %c0_11 = arith.constant 0 : index
    %c0_12 = arith.constant 0 : index
    %15 = vector.load %arg4[%c0_11, %c0_12] : memref<32x128xf32, #tpu.memory_space<vmem>>, vector<32x128xf32>
    %c2 = arith.constant 2 : index
    %c0_13 = arith.constant 0 : index
    %16 = vector.load %arg5[%c2, %c0_13] : memref<3x128xf32, #tpu.memory_space<vmem>>, vector<1x128xf32>
    %cst_14 = arith.constant dense<0.000000e+00> : vector<16x128xf32>
    %17 = tpu.matmul %14, %15, %cst_14 {dimension_numbers = #tpu.dot_dimension_numbers<[1], [0], [0], [1], [0, 0, 1, 1], [], []>} : vector<16x32xf32>, vector<32x128xf32>, vector<16x128xf32> -> vector<16x128xf32>
    %18 = vector.broadcast %16 : vector<1x128xf32> to vector<16x128xf32>
    %19 = arith.addf %17, %18 : vector<16x128xf32>
    %c0_15 = arith.constant 0 : index
    %c0_16 = arith.constant 0 : index
    %20 = vector.load %arg6[%c0_15, %c0_16] : memref<16x128xf32, #tpu.memory_space<vmem>>, vector<16x128xf32>
    tpu.vector_store %arg6[%c0_15, %c0_16], %19 {strides = array<i32>} : memref<16x128xf32, #tpu.memory_space<vmem>>, vector<16x128xf32>,
    return
  }
  func.func @transform_0(%arg0: i32) -> (i32, i32) {
    %c0_i32 = arith.constant 0 : i32
    %c0_i32_0 = arith.constant 0 : i32
    return %arg0, %c0_i32 : i32, i32
  }
  func.func @transform_1(%arg0: i32) -> (i32, i32) {
    %c0_i32 = arith.constant 0 : i32
    %c0_i32_0 = arith.constant 0 : i32
    %c0_i32_1 = arith.constant 0 : i32
    return %c0_i32, %c0_i32_0 : i32, i32
  }
  func.func @transform_2(%arg0: i32) -> (i32, i32) {
    %c0_i32 = arith.constant 0 : i32
    %c0_i32_0 = arith.constant 0 : i32
    %c0_i32_1 = arith.constant 0 : i32
    return %c0_i32, %c0_i32_0 : i32, i32
  }
  func.func @transform_3(%arg0: i32) -> (i32, i32) {
    %c0_i32 = arith.constant 0 : i32
    %c0_i32_0 = arith.constant 0 : i32
    %c0_i32_1 = arith.constant 0 : i32
    return %c0_i32, %c0_i32_0 : i32, i32
  }
  func.func @transform_4(%arg0: i32) -> (i32, i32) {
    %c0_i32 = arith.constant 0 : i32
    %c0_i32_0 = arith.constant 0 : i32
    %c0_i32_1 = arith.constant 0 : i32
    return %c0_i32, %c0_i32_0 : i32, i32
  }
  func.func @transform_5(%arg0: i32) -> (i32, i32) {
    %c0_i32 = arith.constant 0 : i32
    %c0_i32_0 = arith.constant 0 : i32
    return %arg0, %c0_i32 : i32, i32
  }
}

</mosaic_0001>

<bundles_post_ra>
// kernel: _forward.1
= control target key start
LH: loop header
LB: loop body
LE: loop exit
PB: predicated region body
PF: predicated region fallthrough
CT: control target
= control target key end

     0   :  { %10 = vsyncpa [#allocation3], 0  ;;  %s1303_s0 = inlined_call_operand.hbm [shape: f32[32,32], index: 0, kind: input, shape index: {}]   ;;  %s1304_s1 = inlined_call_operand.hbm [shape: f32[32,64], index: 1, kind: input, shape index: {}]   ;;  %s1305_s2 = inlined_call_operand.hbm [shape: f32[64,32], index: 2, kind: input, shape index: {}]   ;;  %s1306_s3 = inlined_call_operand.hbm [shape: f32[32,128], index: 3, kind: input, shape index: {}]   ;;  %s1307_s4 = inlined_call_operand.vmem [shape: f32[3,128], index: 4, kind: input, shape index: {}]   ;;  %s1308_s5 = inlined_call_operand.vmem [shape: f32[32,128], index: 5, kind: output, shape index: {}]  }
   0x1   :  { %12 = vsyncpa [#allocation3 + $0x1], 0 }
   0x2   :  { %13 = vsyncpa [#allocation5], 0 }
   0x3   :  { %14 = vsyncpa [#allocation8], 0  ;;  %s1061_s18 = smov 0   ;;  %s1063_s19 = smov 0  }
   0x4   :  { %s1065_s20 = smov 0   ;;  %s1067_s21 = smov 0  }
   0x5 LB: > { %s671_s22 = sadd.s32 4294967295, %s1023_s21   ;;  %p40_p0 = scmp.ne.s32.totalorder %s1015_s19, %s1011_s18  ;;  %s1023_s21 = sphi %s1067_s21, %s1325_s21   ;;  %s1019_s20 = sphi %s1065_s20, %s1324_s20   ;;  %s1015_s19 = sphi %s1063_s19, %s1323_s19   ;;  %s1011_s18 = sphi %s1061_s18, %s1322_s18  }
   0x6   : > { %p1083_p1 = scmp.eq.s32.totalorder %s671_s22, 0  ;;  %p673_p2 = scmp.ge.s32.totalorder %s1023_s21, 1 }
   0x7   : > { %p161_p3 = scmp.lt.s32.totalorder %s1023_s21, 3  ;;  %s1025_s26 = smov [#allocation4]  }
   0x8   : > { %s1313_s23 = scalar_select %p1083_p1, 1, 0 }
   0x9   : > { %p1091_p4 = por %p1083_p1, %p40_p0  ;;  %p1095_p5 = pnand %p673_p2, %p161_p3 }
   0xa   : > { %s173_s27 = sshll.u32 %s1025_s26, 4  ;;  %s1026_s29 = smov [#allocation6]   ;;  %s1099_s27 = int_to_ptr.vmem [resolvable:$true] %s173_s27 }
   0xb   : > { %s1314_s24 = scalar_select %p1091_p4, 1, 0 }
   0xc   : > { %s1315_s25 = scalar_select %p1095_p5, 1, 0 }
   0xd   : > { %p809_p6 = pneg %p1095_p5  ;;  %s186_s30 = sshll.u32 %s1026_s29, 4  ;;  %s1109_s30 = int_to_ptr.vmem [resolvable:$true] %s186_s30 }
   0xe   : > { %s1027_s6 = smov [#allocation7]   ;;  %s867_s10 = scalar_lea.hbm %s1304_s1, 512 }
   0xf   : > { %p1105_p7 = pnand %p809_p6, %p1083_p1  ;;  %s1111_s7 = sshll.u32 %s1027_s6, 4  ;;  %s200_s7 = int_to_ptr.vmem [resolvable:$true] %s1111_s7 }
  0x10   : > { %p868_p8 = scmp.ne.s32.totalorder %s1304_s1, %s867_s10  ;;  %p874_p12 = scmp.lt.u32.totalorder %s867_s10, %s1304_s1 }
  0x11   : > { %p1121_p9 = pneg %p1105_p7 }
  0x13   : > { %p870_p10 = pnand %p1121_p9, %p868_p8 }
  0x15   : > { %p871_p11 = pneg %p870_p10 }
  0x17   : > { %p876_p13 = pnand %p874_p12, %p871_p11 }
  0x19   : > { %879 = shalt.err (!%p876_p13)
}
  0x1a   : > { %s880_s16 = scalar_lea.vmem %s1099_s27, 512  ;;  %p888_p6 = scmp.lt.s32.totalorder %s1099_s27, %s1099_s27 }
  0x1b   : > { %p881_p0 = scmp.ne.s32.totalorder %s1099_s27, %s880_s16  ;;  %p889_p1 = scmp.lt.s32.totalorder %s880_s16, %s880_s16 }
  0x1d   : > { %p883_p2 = pnand %p881_p0, %p1121_p9  ;;  %p890_p8 = por %p889_p1, %p888_p6 }
  0x1f   : > { %p884_p3 = pneg %p883_p2 }
  0x21   : > { %p891_p10 = pnand %p890_p8, %p884_p3 }
  0x23   : > { %894 = shalt.err (!%p891_p10)
}
  0x24   : > { %s1028_s17 = smov 128   ;;  %s1029_s18 = smov 8  }
  0x25   : > { %812 = dma.hbm_to_vmem [thread:$0]  (!%p1105_p7), %s1304_s1, 512, %s1099_s27, [#allocation5], %s1028_s17, %s1028_s17, %s1029_s18  }
  0x26   : > { %s895_s9 = scalar_lea.hbm %s1305_s2, 1024 }
  0x27   : > { %p896_p1 = scmp.ne.s32.totalorder %s1305_s2, %s895_s9  ;;  %p902_p13 = scmp.lt.u32.totalorder %s895_s9, %s1305_s2 }
  0x29   : > { %p898_p11 = pnand %p896_p1, %p1121_p9 }
  0x2b   : > { %p899_p12 = pneg %p898_p11 }
  0x2d   : > { %p904_p0 = pnand %p902_p13, %p899_p12 }
  0x2f   : > { %907 = shalt.err (!%p904_p0)
}
  0x30   : > { %s908_s27 = scalar_lea.vmem %s1109_s30, 1024  ;;  %p916_p8 = scmp.lt.s32.totalorder %s1109_s30, %s1109_s30 }
  0x31   : > { %p909_p2 = scmp.ne.s32.totalorder %s1109_s30, %s908_s27  ;;  %p917_p10 = scmp.lt.s32.totalorder %s908_s27, %s908_s27 }
  0x33   : > { %p911_p3 = pnand %p909_p2, %p1121_p9  ;;  %p918_p1 = por %p917_p10, %p916_p8 }
  0x35   : > { %p912_p6 = pneg %p911_p3 }
  0x37   : > { %p919_p11 = pnand %p918_p1, %p912_p6 }
  0x39   : > { %922 = shalt.err (!%p919_p11)
}
  0x3a   : > { %815 = dma.hbm_to_vmem [thread:$0]  (!%p1105_p7), %s1305_s2, 1024, %s1109_s30, [#allocation5], %s1028_s17, %s1028_s17, %s1029_s18  }
  0x3b   : > { %s923_s6 = scalar_lea.hbm %s1306_s3, 512 }
  0x3c   : > { %p924_p12 = scmp.ne.s32.totalorder %s1306_s3, %s923_s6  ;;  %p930_p2 = scmp.lt.u32.totalorder %s923_s6, %s1306_s3 }
  0x3e   : > { %p926_p13 = pnand %p924_p12, %p1121_p9 }
  0x40   : > { %p927_p0 = pneg %p926_p13 }
  0x42   : > { %p932_p3 = pnand %p930_p2, %p927_p0 }
  0x44   : > { %935 = shalt.err (!%p932_p3)
}
  0x45   : > { %s936_s12 = scalar_lea.vmem %s200_s7, 512  ;;  %p944_p1 = scmp.lt.s32.totalorder %s200_s7, %s200_s7 }
  0x46   : > { %p937_p6 = scmp.ne.s32.totalorder %s200_s7, %s936_s12  ;;  %p945_p11 = scmp.lt.s32.totalorder %s936_s12, %s936_s12 }
  0x48   : > { %p939_p8 = pnand %p937_p6, %p1121_p9  ;;  %p946_p4 = por %p945_p11, %p944_p1 }
  0x4a   : > { %p940_p10 = pneg %p939_p8 }
  0x4c   : > { %p947_p5 = pnand %p946_p4, %p940_p10 }
  0x4e   : > { %950 = shalt.err (!%p947_p5)
}
  0x4f   : > { %818 = dma.hbm_to_vmem [thread:$0]  (!%p1105_p7), %s1306_s3, 512, %s200_s7, [#allocation8], %s1028_s17, %s1028_s17, %s1029_s18  }
  0x50   : > { %s1194_s13 = sadd.s32 1, %s1023_s21   ;;  %s27_s27 = sadd.s32 1, %s1019_s20 }
  0x51   : > { %s24_s28 = ssub.s32 %s1023_s21, %s1194_s13  ;;  %p34_p5 = scmp.ne.s32.totalorder %s1019_s20, %s1015_s19 }
  0x52   : > { %p25_p4 = scmp.eq.s32.totalorder %s24_s28, 0  ;;  %p35_p9 = scmp.eq.s32.totalorder %s1023_s21, 0 }
  0x53   : > { %p826_p12 = scmp.lt.s32.totalorder %s1023_s21, 2  ;;  %s216_s16 = sand.u32 1, %s1019_s20  }
  0x54   : > { %s1204_s15 = scalar_select %p25_p4, %s1019_s20, %s27_s27  }
  0x55   : > { %p36_p13 = por %p35_p9, %p34_p5  ;;  %s678_s26 = sshll.u32 %s216_s16, 4 }
  0x56   : > { %s699_s29 = sshll.u32 %s1023_s21, 8  ;;  %s220_s7 = scalar_lea.vmem [#allocation2], %s678_s26 }
  0x57   : > { %s1211_s9 = scalar_lea.hbm %s1303_s0, %s699_s29  ;;  %s227_s10 = sshll.u32 %s220_s7, 4  ;;  %s1213_s10 = int_to_ptr.vmem [resolvable:$true] %s227_s10 }
  0x58   : > { %p1215_p7 = pnand %p826_p12, %p36_p13  ;;  %s1219_s12 = scalar_lea.sflag [#allocation3], %s216_s16 }
  0x59   : > { %s951_s30 = scalar_lea.hbm %s1211_s9, 256  ;;  %s956_s27 = scalar_lea.hbm %s1303_s0, 512 }
  0x5a   : > { %p952_p0 = scmp.ne.s32.totalorder %s1211_s9, %s951_s30  ;;  %p953_p2 = pneg %p1215_p7 }
  0x5b   : > { %p957_p8 = scmp.lt.u32.totalorder %s1211_s9, %s1303_s0  ;;  %p958_p10 = scmp.lt.u32.totalorder %s956_s27, %s951_s30 }
  0x5c   : > { %p954_p3 = pnand %p953_p2, %p952_p0  ;;  %p960_p11 = scmp.lt.u32.totalorder %s951_s30, %s1211_s9 }
  0x5d   : > { %p959_p1 = por %p958_p10, %p957_p8 }
  0x5e   : > { %p955_p6 = pneg %p954_p3 }
  0x5f   : > { %p961_p4 = por %p960_p11, %p959_p1 }
  0x61   : > { %p962_p5 = pnand %p961_p4, %p955_p6 }
  0x63   : > { %965 = shalt.err (!%p962_p5)
}
  0x64   : > { %s966_s16 = scalar_lea.vmem %s1213_s10, 256  ;;  %s1030_s6 = smov [#allocation2]  }
  0x65   : > { %p967_p9 = scmp.ne.s32.totalorder %s1213_s10, %s966_s16  ;;  %s971_s8 = sshll.u32 %s1030_s6, 4  ;;  %s972_s8 = int_to_ptr.vmem [resolvable:$false] %s971_s8 }
  0x66   : > { %s973_s7 = scalar_lea.vmem %s972_s8, 512  ;;  %p974_p0 = scmp.lt.s32.totalorder %s1213_s10, %s972_s8 }
  0x67   : > { %p969_p12 = pnand %p967_p9, %p953_p2  ;;  %p975_p3 = scmp.lt.s32.totalorder %s973_s7, %s966_s16 }
  0x69   : > { %p970_p13 = pneg %p969_p12  ;;  %p976_p8 = por %p975_p3, %p974_p0 }
  0x6b   : > { %p977_p10 = pnand %p976_p8, %p970_p13 }
  0x6d   : > { %980 = shalt.err (!%p977_p10)
}
  0x6e   : > { %822 = dma.hbm_to_vmem [thread:$0]  (!%p1215_p7), %s1211_s9, 256, %s1213_s10, %s1219_s12, %s1028_s17, %s1028_s17, %s1029_s18  }
  0x6f   : > { %p1319_p2 = scmp.ne.s32.totalorder %s1315_s25, 0 }
  0x70   : > { %s241_s30 = sand.u32 (!%p1319_p2), 1, %s1015_s19   ;;  %p1320_p6 = scmp.ne.s32.totalorder (!%p1319_p2), %s1314_s24, 0 }
  0x71   : > { %239 = sbr.rel (%p1319_p2) target bundleno = 789 (0x315), region = 40  ;;  %s1253_s14 = sshll.u32 (!%p1319_p2), %s241_s30, 4 }
  0x72   : > { %s242_s28 = scalar_lea.sflag (!%p1319_p2), [#allocation3], %s241_s30  ;;  %s245_s27 = scalar_lea.vmem (!%p1319_p2), [#allocation2], %s1253_s14 }
  0x78   : > { %998 = dma.done.wait (%p1320_p6), %s242_s28, 256  }
  0x79   : > { %1000 = vsyncadd (%p1320_p6), %s242_s28, 4294967040  ;;  %p1321_p1 = scmp.ne.s32.totalorder %s1313_s23, 0 }
  0x7b   : > { %1002 = dma.done.wait (%p1321_p1), [#allocation5], 1536  }
  0x7c   : > { %1004 = vsyncadd (%p1321_p1), [#allocation5], 4294965760 }
  0x7d   : > { %1006 = dma.done.wait (%p1321_p1), [#allocation8], 512  }
  0x7e   : > { %1008 = vsyncadd (%p1321_p1), [#allocation8], 4294966784  ;;  %vm302_vm0 = vcmask 261120   ;;  %v293_v0 = vld [vmem:[#allocation4] sm:$0xff]  ;;  %v294_v1 = vld [vmem:[#allocation4 + $0x8] sm:$0xff]  ;;  %vm399_vm1 = vcmask 523264  }
  0x7f   : > { %v295_v2 = vld [vmem:[#allocation4 + $0x10] sm:$0xff]  ;;  %v763_v3 = vpack.c.bf16 %v294_v1, %v293_v0  ;;  %v296_v4 = vld [vmem:[#allocation4 + $0x18] sm:$0xff]  ;;  %v386_v7 = vld [vmem:[#allocation6] sm:$0xff]  ;;  %s686_s18 = sshll.u32 %s671_s22, 1 }
  0x80   : > { %v291_v5 = vld [vmem:[%s245_s27] sm:$0xff]  ;;  %v767_v6 = vpack.c.bf16 %v296_v4, %v295_v2  ;;  %v387_v8 = vld [vmem:[#allocation6 + $0x8] sm:$0xff]  ;;  %v389_v11 = vld [vmem:[#allocation6 + $0x18] sm:$0xff]  ;;  %p286_p7 = scmp.lt.s32.totalorder %s686_s18, 3 }
  0x81   : > { %730 = vmatprep.mubr.msk.f32.mxu0 %vm302_vm0, %v291_v5  ;;  %v388_v9 = vld [vmem:[#allocation6 + $0x10] sm:$0xff]  ;;  %764 = vmatprep.subr.bf16.mxu0 %v763_v3  ;;  %v771_v10 = vpack.c.bf16 %v387_v8, %v386_v7  ;;  %v390_v13 = vld [vmem:[#allocation6 + $0x20] sm:$0xff]  ;;  %v391_v14 = vld [vmem:[#allocation6 + $0x28] sm:$0xff] }
  0x82   : > { %766 = vmatpush3.bf16.msra.mxu0 %v763_v3  ;;  %v775_v12 = vpack.c.bf16 %v389_v11, %v388_v9  ;;  %v779_v15 = vpack.c.bf16 %v391_v14, %v390_v13  ;;  %v292_v16 = vld [vmem:[%s245_s27 + $0x8] sm:$0xff]  ;;  %v392_v17 = vld [vmem:[#allocation6 + $0x30] sm:$0xff]  ;;  %v483_v20 = vld [vmem:[#allocation7] sm:$0xff]  ;;  %s1327_s18 = smov (!%p286_p7, %s686_s18), 3 }
  0x83   : > { %768 = vmatprep.subr.bf16.mxu0 %v767_v6  ;;  %772 = vmatprep.subr.bf16.mxu1 %v771_v10  ;;  %v393_v18 = vld [vmem:[#allocation6 + $0x38] sm:$0xff]  ;;  %v484_v21 = vld [vmem:[#allocation7 + $0x8] sm:$0xff]  ;;  %v688_v23 = vld [vmem:[%s1307_s4] ss:$0 sm:$0xff]  ;;  %s687_s9 = sshll.u32 %s1327_s18, 3 }
  0x84   : > { %774 = vmatpush3.bf16.msra.mxu1 %v771_v10  ;;  %v783_v19 = vpack.c.bf16 %v393_v18, %v392_v17  ;;  %v787_v22 = vpack.c.bf16 %v484_v21, %v483_v20  ;;  %v485_v30 = vld [vmem:[#allocation7 + $0x10] sm:$0xff]  ;;  %v486_v31 = vld [vmem:[#allocation7 + $0x18] sm:$0xff]  ;;  %v691_v33 = vld [vmem:[%s1307_s4 + $0x1] ss:$0 sm:$0xff]  ;;  %s289_s29 = scalar_lea.vmem %s1308_s5, %s687_s9 }
  0x85   : > { %776 = vmatprep.subr.bf16.mxu1 %v775_v12  ;;  %v791_v32 = vpack.c.bf16 %v486_v31, %v485_v30  ;;  %v694_v40 = vld [vmem:[%s1307_s4 + $0x2] ss:$0 sm:$0xff] }
  0x86   : > { %770 = vmatpush3.bf16.msra.mxu0 %v767_v6 }
  0x87   : > { %788 = vmatprep.subr.bf16.mxu0 %v787_v22 }
  0x88   : > { %778 = vmatpush3.bf16.msra.mxu1 %v775_v12 }
  0x89   : > { %731 = vmatmul.mubr.msk.f32.vlgmr.msra.gmra.mrb[0].mxu0 %vm302_vm0, %v292_v16  ;;  %780 = vmatprep.subr.bf16.mxu1 %v779_v15 }
  0x8a   : > { %790 = vmatpush3.bf16.msra.mxu0 %v787_v22 }
  0x8b   : > { %792 = vmatprep.subr.bf16.mxu0 %v791_v32 }
  0x8c   : > { %782 = vmatpush3.bf16.msra.mxu1 %v779_v15 }
  0x8d   : > { %784 = vmatprep.subr.bf16.mxu1 %v783_v19 }
  0x8e   : > { %794 = vmatpush3.bf16.msra.mxu0 %v791_v32 }
  0x90   : > { %786 = vmatpush3.bf16.msra.mxu1 %v783_v19 }
 0x15c   : > { %v732_v24 = vpop.f32.mrb[0].mxu0 }
 0x15d   : > { %v381_v25 = vadd.f32 %v732_v24, %v688_v23  ;;  %v375_v26 = vpop.f32.mrb[1].mxu0 }
 0x15e   : > { %v376_v27 = vadd.f32 %v688_v23, %v375_v26 }
 0x15f   : > { %v385_v29 = vmax.f32 %v381_v25, 0.0 }
 0x160   : > { %v384_v28 = vmax.f32 %v376_v27, 0.0 }
 0x162   : > { %749 = vmatprep.mubr.msk.f32.mxu1 %vm399_vm1, %v384_v28 }
 0x163   : > { %750 = vmatmul.mubr.msk.f32.vlgmr.msra.gmra.mrb[0].mxu1 %vm399_vm1, %v385_v29 }
 0x236   : > { %v751_v34 = vpop.f32.mrb[0].mxu1 }
 0x237   : > { %v478_v35 = vadd.f32 %v751_v34, %v691_v33  ;;  %v472_v36 = vpop.f32.mrb[1].mxu1 }
 0x238   : > { %v473_v37 = vadd.f32 %v691_v33, %v472_v36 }
 0x239   : > { %v482_v39 = vmax.f32 %v478_v35, 0.0 }
 0x23a   : > { %v481_v38 = vmax.f32 %v473_v37, 0.0 }
 0x23c   : > { %760 = vmatprep.mubr.msk.f32.mxu0 %vm302_vm0, %v481_v38 }
 0x23d   : > { %761 = vmatmul.mubr.msk.f32.vlgmr.msra.gmra.mrb[2].mxu0 %vm302_vm0, %v482_v39 }
 0x310   : > { %v762_v41 = vpop.f32.mrb[2].mxu0 }
 0x311   : > { %v564_v42 = vpop.f32.mrb[3].mxu0  ;;  %v570_v44 = vadd.f32 %v762_v41, %v694_v40 }
 0x312   : > { %v565_v43 = vadd.f32 %v694_v40, %v564_v42 }
 0x313   : > { %574 = vst [vmem:[%s289_s29 + $0x8] sm:$0xff] %v570_v44 }
 0x314   : > { %573 = vst [vmem:[%s289_s29] sm:$0xff] %v565_v43 }
 0x315 PF: > { %p17_p11 = scmp.ge.s32.totalorder %s1194_s13, 4   ;;  %s1322_s18 = smov %s1015_s19 }
 0x316   : > { %s1323_s19 = smov %s1019_s20  ;;  %s1324_s20 = smov %s1204_s15 }
 0x317   : > { %s1325_s21 = smov %s1194_s13  ;;  %19 = sbr.rel (!%p17_p11) target bundleno = 5 (0x5), region = 92 }
 0x31e   :  { %597 = vsyncpa [#allocation3], 1 }
 0x31f   :  { %599 = vsyncpa [#allocation3 + $0x1], 1 }
 0x320   :  { %600 = vsyncpa [#allocation5], 1 }
 0x321   :  { %601 = vsyncpa [#allocation8], 1 }

</bundles_post_ra>
